<compile_context>
chip_gen: v5e
topology: v5e:2x2
jax: 0.10.0
libtpu: 0.0.40
codegen_flags: <defaults>
</compile_context>

<pallas_src>
import math
from functools import partial

import jax
import jax.numpy as jnp
import numpy as np
from jax import lax
from jax.experimental import pallas as pl
from jax.experimental.pallas import tpu as pltpu


# ---------------------------------------------------------------------------
# In-kernel helpers (traced inside the Pallas body)
# ---------------------------------------------------------------------------
def _layernorm(x, gamma, beta, eps=1e-5):
    mu = jnp.mean(x, axis=-1, keepdims=True)
    var = jnp.mean((x - mu) ** 2, axis=-1, keepdims=True)  # biased var (PyTorch LN)
    return (x - mu) * lax.rsqrt(var + eps) * gamma + beta


def _gelu_exact(x):
    # nn.GELU() default: exact erf-based GELU
    return 0.5 * x * (1.0 + lax.erf(x * (1.0 / math.sqrt(2.0))))


def _gelu_tanh(x):
    # approximate (tanh) GELU -- goes to the EUP, relieving VALU slots on v5e
    c = math.sqrt(2.0 / math.pi)
    return 0.5 * x * (1.0 + jnp.tanh(c * (x + 0.044715 * x * x * x)))


# ---------------------------------------------------------------------------
# Pallas kernel: one grid step == Bt batch elements, full (Bt, S, E) slab
# ---------------------------------------------------------------------------
def transformer_block_kernel(num_heads, compute_dtype, gelu_approx,
                             x_ref, g1_ref, be1_ref,
                             wqkv_ref, bqkv_ref, wo_ref, bo_ref,
                             g2_ref, be2_ref,
                             w1_ref, bm1_ref, w2_ref, bm2_ref,
                             o_ref):
    Bt, S, E = x_ref.shape
    H = num_heads
    D = E // H
    cd = compute_dtype
    exact = np.dtype(cd) == np.dtype(jnp.float32)

    # Fold batch into the matmul M dimension.  Major-dim merge -> layout-free
    # when S % 8 == 0; no concat loops, no extra VMEM copies.
    x2 = x_ref[...].reshape(Bt * S, E)                                # (R, E) f32

    # ---- LayerNorm 1 + fused QKV projection (one MXU pass, N = 3E) ---------
    xn = _layernorm(x2, g1_ref[...], be1_ref[...])
    qkv = jnp.dot(xn.astype(cd), wqkv_ref[...],
                  preferred_element_type=jnp.float32) + bqkv_ref[...]  # (R, 3E)
    # NOTE: the 1/sqrt(D) attention scale is already folded into the Q columns
    # of wqkv / bqkv (wrapper-side, one-time weight transform).
    qkv3 = qkv.reshape(Bt, S, 3 * E)                 # major-dim split (free)

    # ---- attention: per-head, batched over the Bt batch dim ----------------
    # Short static loop over H heads; every op inside is batched over Bt, so
    # each einsum sees the full Bt*S rows of MXU work and the live scores
    # buffer stays (Bt, S, S) (not (Bt*H, S, S)) -- the term that first breaks
    # v7x's 64 MiB VMEM.  No 4-D transposes / lane-splitting reshapes are used.
    # TODO(synk): for S >~ 1k additionally tile the KV axis with an online
    # softmax (flash-style m/l/acc scratch) so scores stay (Bt, S, tk).
    attn = jnp.zeros((Bt * S, E), jnp.float32)
    for h in range(H):
        q_h = qkv3[:, :, 0 * E + h * D:0 * E + (h + 1) * D].astype(cd)  # (Bt,S,D)
        k_h = qkv3[:, :, 1 * E + h * D:1 * E + (h + 1) * D].astype(cd)
        v_h = qkv3[:, :, 2 * E + h * D:2 * E + (h + 1) * D].astype(cd)

        s_h = jnp.einsum('bqd,bkd->bqk', q_h, k_h,
                         preferred_element_type=jnp.float32)            # (Bt,S,S)
        m_h = jnp.max(s_h, axis=-1, keepdims=True)
        p_h = jnp.exp(s_h - m_h)
        denom = jnp.sum(p_h, axis=-1, keepdims=True)
        p_h = p_h * pl.reciprocal(denom, approx=not exact)
        o_h = jnp.einsum('bqk,bkd->bqd', p_h.astype(cd), v_h,
                         preferred_element_type=jnp.float32)            # (Bt,S,D)

        # Per-head partial output projection: sum_h o_h @ Wo[h] == concat_h(o_h) @ Wo,
        # so the head merge (lane-axis concat / XLU shuffles) never exists.
        attn = attn + jnp.dot(o_h.reshape(Bt * S, D).astype(cd), wo_ref[h],
                              preferred_element_type=jnp.float32)

    x1 = x2 + attn + bo_ref[...]                                        # residual 1

    # ---- LayerNorm 2 + MLP --------------------------------------------------
    xn2 = _layernorm(x1, g2_ref[...], be2_ref[...])
    h1 = jnp.dot(xn2.astype(cd), w1_ref[...],
                 preferred_element_type=jnp.float32) + bm1_ref[...]
    h1 = _gelu_tanh(h1) if gelu_approx else _gelu_exact(h1)
    h2 = jnp.dot(h1.astype(cd), w2_ref[...],
                 preferred_element_type=jnp.float32) + bm2_ref[...]
    # TODO(synk): dropout omitted (eval-mode identity); training-mode dropout
    # would need pltpu.prng_seed / pltpu.prng_random_bits masking.
    y = x1 + h2                                                         # residual 2

    # Single whole-slab store (major-dim split); no per-b store loop.
    o_ref[...] = y.reshape(Bt, S, E).astype(o_ref.dtype)


# ---------------------------------------------------------------------------
# Wrapper-side sizing helpers
# ---------------------------------------------------------------------------
def _vmem_limit_bytes():
    """Per-generation scoped-VMEM limit (~75% of physical, capped)."""
    try:
        cap = pltpu.get_tpu_info().vmem_capacity_bytes
    except Exception:
        cap = 64 * 1024 * 1024            # conservative (v7x-sized) fallback
    return int(max(32 * 1024 * 1024, min(int(cap * 3 / 4), 110 * 1024 * 1024)))


def _step_vmem_bytes(Bt, S, E, H, M, w_itemsize):
    """Rough per-grid-step VMEM working set of the kernel above."""
    f32 = 4
    R = Bt * S
    slabs = 2 * (2 * R * E * f32)          # double-buffered input + output slabs
    qkv = 2 * R * 3 * E * f32              # qkv + its (Bt, S, 3E) view
    scores = 2 * Bt * S * S * f32          # per-head scores + probs (one head live)
    resid = 4 * R * E * f32                # x2 / xn / attn / x1 temporaries
    mlp = R * M * f32
    weights = (E * 3 * E + E * E + E * M + M * E) * w_itemsize
    return slabs + qkv + scores + resid + mlp + weights


def _pick_batch_block(B, S, E, H, M, w_itemsize, vmem_budget):
    """Largest divisor of B that (a) targets >=256 matmul rows per step,
    (b) keeps >=2 grid steps when B >= 2 (pipelining + v7x megacore), and
    (c) fits the per-step VMEM budget."""
    divisors = [d for d in range(1, B + 1) if B % d == 0]
    target_rows = 256
    best = 1
    for d in divisors:                      # ascending -> keeps the largest valid
        if d * S <= max(target_rows, S) and (B // d >= 2 or B == 1):
            best = d
    while best > 1 and _step_vmem_bytes(best, S, E, H, M, w_itemsize) > vmem_budget:
        best = max(d for d in divisors if d < best)
    return best


# ---------------------------------------------------------------------------
# Wrapper
# ---------------------------------------------------------------------------
def transformer_block(x, params, num_heads, *, batch_block=None,
                      compute_dtype=jnp.bfloat16, batch_major_input=False,
                      gelu_approx=False):
    """ViT TransformerBlock forward (eval mode: dropout == identity).

    x: (S, B, E) float32 (PyTorch nn.MultiheadAttention layout) by default, or
       (B, S, E) if batch_major_input=True.  Output matches the input layout.
    batch_block: batch elements folded into each grid step (default: auto-sized
       for MXU M-fill, >=2 grid steps, and the per-generation VMEM budget).
    compute_dtype: dtype of matmul *inputs* (bf16 doubles MXU throughput and
       halves resident weight VMEM); accumulation is always f32.
    gelu_approx: tanh GELU approximation (EUP path; VALU relief on v5e).
       Default False == exact erf GELU (matches nn.GELU()).
    """
    if batch_major_input:
        xb = x
        B, S, E = x.shape
    else:
        S, B, E = x.shape
        # One boundary transpose to batch-major; a batch-major end-to-end ViT
        # (batch_major_input=True) pays zero here.
        xb = jnp.transpose(x, (1, 0, 2))

    H = num_heads
    D = E // H
    M = params['w1'].shape[1]
    cd = compute_dtype
    w_itemsize = np.dtype(cd).itemsize

    vmem_limit = _vmem_limit_bytes()
    if batch_block is None:
        Bt = _pick_batch_block(B, S, E, H, M, w_itemsize, int(vmem_limit * 0.6))
    else:
        Bt = batch_block
    assert B % Bt == 0, "batch_block must divide the batch size"

    # Fused QKV packing with the 1/sqrt(D) attention scale folded into the Q
    # columns (one-time weight transform), plus Wo pre-split per head for the
    # partial output projections.  Optional bf16 weight cast done once here.
    scale = 1.0 / math.sqrt(D)
    wqkv = jnp.concatenate([params['wq'] * scale, params['wk'], params['wv']], axis=1)
    bqkv = jnp.concatenate([params['bq'] * scale, params['bk'], params['bv']], axis=1)
    wo_h = params['wo'].reshape(H, D, E)
    weights = [
        params['g1'], params['be1'],
        wqkv.astype(cd), bqkv,
        wo_h.astype(cd), params['bo'],
        params['g2'], params['be2'],
        params['w1'].astype(cd), params['bm1'],
        params['w2'].astype(cd), params['bm2'],
    ]

    def full_spec(a):
        nd = a.ndim
        # Grid-invariant weights (constant index map -> resident across steps).
        # TODO(synk): if a Mosaic dump shows these double-buffered on v7x, pin
        # them with pipeline_mode=pl.Buffered(1).
        return pl.BlockSpec(a.shape, lambda b, _n=nd: (0,) * _n)

    in_specs = ([pl.BlockSpec((Bt, S, E), lambda b: (b, 0, 0))]
                + [full_spec(a) for a in weights])

    out = pl.pallas_call(
        partial(transformer_block_kernel, num_heads, cd, gelu_approx),
        out_shape=jax.ShapeDtypeStruct((B, S, E), jnp.float32),
        grid_spec=pltpu.PrefetchScalarGridSpec(
            num_scalar_prefetch=0,
            grid=(B // Bt,),
            in_specs=in_specs,
            out_specs=pl.BlockSpec((Bt, S, E), lambda b: (b, 0, 0)),
        ),
        compiler_params=pltpu.CompilerParams(
            # Batch steps are independent -> shard across v7x's 2 TensorCores.
            dimension_semantics=("parallel",),
            vmem_limit_bytes=vmem_limit,
        ),
    )(xb, *weights)
    # NOTE: demo sizes (E=32, M=64 < 128 lanes) force masked vst partial stores;
    # real ViT dims (E=768, M=3072) are already 128/256-lane aligned.  Padding S
    # to a sublane multiple would additionally require masking padded keys to
    # -inf before the softmax.

    if batch_major_input:
        return out
    return jnp.transpose(out, (1, 0, 2))                 # back to (S, B, E)


# ---------------------------------------------------------------------------
# Pure-JAX f32 reference (same math, same weights) for correctness checks
# ---------------------------------------------------------------------------
def reference_block(x, p, num_heads):
    S, B, E = x.shape
    D = E // num_heads

    def ln(v, g, b):
        mu = v.mean(-1, keepdims=True)
        var = ((v - mu) ** 2).mean(-1, keepdims=True)
        return (v - mu) / jnp.sqrt(var + 1e-5) * g + b

    xn = ln(x, p['g1'], p['be1'])
    q = xn @ p['wq'] + p['bq']
    k = xn @ p['wk'] + p['bk']
    v = xn @ p['wv'] + p['bv']
    qh = q.reshape(S, B, num_heads, D)
    kh = k.reshape(S, B, num_heads, D)
    vh = v.reshape(S, B, num_heads, D)
    s = jnp.einsum('sbhd,tbhd->bhst', qh, kh) / math.sqrt(D)
    pmat = jax.nn.softmax(s, axis=-1)
    ao = jnp.einsum('bhst,tbhd->sbhd', pmat, vh).reshape(S, B, E)
    ao = ao @ p['wo'] + p['bo']
    x1 = x + ao
    xn2 = ln(x1, p['g2'], p['be2'])
    h1 = xn2 @ p['w1'] + p['bm1']
    h1 = 0.5 * h1 * (1.0 + lax.erf(h1 / math.sqrt(2.0)))
    h2 = h1 @ p['w2'] + p['bm2']
    return x1 + h2


# ---------------------------------------------------------------------------
# Main
# ---------------------------------------------------------------------------
if __name__ == "__main__":
    S, B, E = 8, 2, 32          # seq, batch, embed_dim
    H, M = 4, 64                # num_heads, mlp_dim

    key = jax.random.PRNGKey(0)
    keys = jax.random.split(key, 12)

    # Deterministic synthetic parameters (Linear weights stored pre-transposed:
    # y = x @ W + b).  Biases / LN params stored as (1, dim) for broadcasting.
    params = {
        'g1':  1.0 + 0.05 * jax.random.normal(keys[0], (1, E), jnp.float32),
        'be1': 0.05 * jax.random.normal(keys[1], (1, E), jnp.float32),
        'wq':  0.1 * jax.random.normal(keys[2], (E, E), jnp.float32),
        'bq':  0.05 * jax.random.normal(keys[3], (1, E), jnp.float32),
        'wk':  0.1 * jax.random.normal(keys[4], (E, E), jnp.float32),
        'bk':  0.05 * jax.random.normal(keys[5], (1, E), jnp.float32),
        'wv':  0.1 * jax.random.normal(keys[6], (E, E), jnp.float32),
        'bv':  0.05 * jax.random.normal(keys[7], (1, E), jnp.float32),
        'wo':  0.1 * jax.random.normal(keys[8], (E, E), jnp.float32),
        'bo':  0.05 * jax.random.normal(keys[9], (1, E), jnp.float32),
        'g2':  1.0 + 0.05 * jax.random.normal(keys[10], (1, E), jnp.float32),
        'be2': 0.05 * jax.random.normal(keys[11], (1, E), jnp.float32),
    }
    key2 = jax.random.PRNGKey(1)
    k2 = jax.random.split(key2, 5)
    params.update({
        'w1':  0.1 * jax.random.normal(k2[0], (E, M), jnp.float32),
        'bm1': 0.05 * jax.random.normal(k2[1], (1, M), jnp.float32),
        'w2':  0.1 * jax.random.normal(k2[2], (M, E), jnp.float32),
        'bm2': 0.05 * jax.random.normal(k2[3], (1, E), jnp.float32),
    })

    x = jax.random.normal(k2[4], (S, B, E), jnp.float32)

    ref = jax.block_until_ready(reference_block(x, params, H))

    # 1) f32 compute path (exact reciprocal): tight check vs f32 reference.
    out_f32 = jax.block_until_ready(
        transformer_block(x, params, H, compute_dtype=jnp.float32))
    assert out_f32.shape == (S, B, E)
    assert jnp.allclose(out_f32, ref, rtol=1e-2, atol=1e-2), "f32 mismatch vs reference"

    # 2) bf16 matmul-input path (f32 accumulation): loose check (bf16 rounding).
    out_bf16 = jax.block_until_ready(
        transformer_block(x, params, H, compute_dtype=jnp.bfloat16))
    assert out_bf16.shape == (S, B, E)
    assert jnp.allclose(out_bf16, ref, rtol=5e-2, atol=5e-2), "bf16 mismatch vs reference"

    print("KERNEL_OK")
</pallas_src>

<mosaic_0001>
module attributes {stable_mosaic.version = 11 : i64} {
  func.func @transformer_block_kernel(%arg0: i32, %arg1: memref<1x8x32xf32, #tpu.memory_space<vmem>>, %arg2: memref<1x32xf32, #tpu.memory_space<vmem>>, %arg3: memref<1x32xf32, #tpu.memory_space<vmem>>, %arg4: memref<32x96xf32, #tpu.memory_space<vmem>>, %arg5: memref<1x96xf32, #tpu.memory_space<vmem>>, %arg6: memref<4x8x32xf32, #tpu.memory_space<vmem>>, %arg7: memref<1x32xf32, #tpu.memory_space<vmem>>, %arg8: memref<1x32xf32, #tpu.memory_space<vmem>>, %arg9: memref<1x32xf32, #tpu.memory_space<vmem>>, %arg10: memref<32x64xf32, #tpu.memory_space<vmem>>, %arg11: memref<1x64xf32, #tpu.memory_space<vmem>>, %arg12: memref<64x32xf32, #tpu.memory_space<vmem>>, %arg13: memref<1x32xf32, #tpu.memory_space<vmem>>, %arg14: memref<1x8x32xf32, #tpu.memory_space<vmem>>) attributes {dimension_semantics = [#tpu.dimension_semantics<parallel>], iteration_bounds = array<i64: 2>, scalar_prefetch = 0 : i64, scratch_operands = 0 : i64, tpu.core_type = #tpu.core_type<tc>, window_params = [{transform_indices = @transform_0, window_bounds = array<i64: 1, 8, 32>}, {pipeline_mode = #tpu.pipeline_mode<synchronous>, transform_indices = @transform_1, window_bounds = array<i64: 1, 32>}, {pipeline_mode = #tpu.pipeline_mode<synchronous>, transform_indices = @transform_2, window_bounds = array<i64: 1, 32>}, {pipeline_mode = #tpu.pipeline_mode<synchronous>, transform_indices = @transform_3, window_bounds = array<i64: 32, 96>}, {pipeline_mode = #tpu.pipeline_mode<synchronous>, transform_indices = @transform_4, window_bounds = array<i64: 1, 96>}, {pipeline_mode = #tpu.pipeline_mode<synchronous>, transform_indices = @transform_5, window_bounds = array<i64: 4, 8, 32>}, {pipeline_mode = #tpu.pipeline_mode<synchronous>, transform_indices = @transform_6, window_bounds = array<i64: 1, 32>}, {pipeline_mode = #tpu.pipeline_mode<synchronous>, transform_indices = @transform_7, window_bounds = array<i64: 1, 32>}, {pipeline_mode = #tpu.pipeline_mode<synchronous>, transform_indices = @transform_8, window_bounds = array<i64: 1, 32>}, {pipeline_mode = #tpu.pipeline_mode<synchronous>, transform_indices = @transform_9, window_bounds = array<i64: 32, 64>}, {pipeline_mode = #tpu.pipeline_mode<synchronous>, transform_indices = @transform_10, window_bounds = array<i64: 1, 64>}, {pipeline_mode = #tpu.pipeline_mode<synchronous>, transform_indices = @transform_11, window_bounds = array<i64: 64, 32>}, {pipeline_mode = #tpu.pipeline_mode<synchronous>, transform_indices = @transform_12, window_bounds = array<i64: 1, 32>}, {transform_indices = @transform_13, window_bounds = array<i64: 1, 8, 32>}]} {
    %c0 = arith.constant 0 : index
    %c0_0 = arith.constant 0 : index
    %c0_1 = arith.constant 0 : index
    %0 = vector.load %arg1[%c0, %c0_0, %c0_1] : memref<1x8x32xf32, #tpu.memory_space<vmem>>, vector<1x8x32xf32>
    %1 = vector.shape_cast %0 : vector<1x8x32xf32> to vector<8x32xf32>
    %c0_2 = arith.constant 0 : index
    %c0_3 = arith.constant 0 : index
    %2 = vector.load %arg2[%c0_2, %c0_3] : memref<1x32xf32, #tpu.memory_space<vmem>>, vector<1x32xf32>
    %c0_4 = arith.constant 0 : index
    %c0_5 = arith.constant 0 : index
    %3 = vector.load %arg3[%c0_4, %c0_5] : memref<1x32xf32, #tpu.memory_space<vmem>>, vector<1x32xf32>
    %cst = arith.constant dense<0.000000e+00> : vector<8xf32>
    %4 = vector.multi_reduction <add>, %1, %cst [1] : vector<8x32xf32> to vector<8xf32>
    %5 = vector.shape_cast %4 : vector<8xf32> to vector<8x1xf32>
    %cst_6 = arith.constant 3.200000e+01 : f32
    %6 = vector.broadcast %cst_6 : f32 to vector<8x1xf32>
    %7 = arith.divf %5, %6 : vector<8x1xf32>
    %8 = vector.broadcast %7 : vector<8x1xf32> to vector<8x32xf32>
    %9 = arith.subf %1, %8 : vector<8x32xf32>
    %10 = arith.mulf %9, %9 : vector<8x32xf32>
    %cst_7 = arith.constant dense<0.000000e+00> : vector<8xf32>
    %11 = vector.multi_reduction <add>, %10, %cst_7 [1] : vector<8x32xf32> to vector<8xf32>
    %12 = vector.shape_cast %11 : vector<8xf32> to vector<8x1xf32>
    %cst_8 = arith.constant 3.200000e+01 : f32
    %13 = vector.broadcast %cst_8 : f32 to vector<8x1xf32>
    %14 = arith.divf %12, %13 : vector<8x1xf32>
    %15 = vector.broadcast %7 : vector<8x1xf32> to vector<8x32xf32>
    %16 = arith.subf %1, %15 : vector<8x32xf32>
    %cst_9 = arith.constant 9.99999974E-6 : f32
    %17 = vector.broadcast %cst_9 : f32 to vector<8x1xf32>
    %18 = arith.addf %14, %17 : vector<8x1xf32>
    %19 = math.rsqrt %18 : vector<8x1xf32>
    %20 = vector.broadcast %19 : vector<8x1xf32> to vector<8x32xf32>
    %21 = arith.mulf %16, %20 : vector<8x32xf32>
    %22 = vector.broadcast %2 : vector<1x32xf32> to vector<8x32xf32>
    %23 = arith.mulf %21, %22 : vector<8x32xf32>
    %24 = vector.broadcast %3 : vector<1x32xf32> to vector<8x32xf32>
    %25 = arith.addf %23, %24 : vector<8x32xf32>
    %c0_10 = arith.constant 0 : index
    %c0_11 = arith.constant 0 : index
    %26 = vector.load %arg4[%c0_10, %c0_11] : memref<32x96xf32, #tpu.memory_space<vmem>>, vector<32x96xf32>
    %cst_12 = arith.constant dense<0.000000e+00> : vector<8x96xf32>
    %27 = tpu.matmul %25, %26, %cst_12 {dimension_numbers = #tpu.dot_dimension_numbers<[1], [0], [0], [1], [0, 0, 1, 1], [], []>} : vector<8x32xf32>, vector<32x96xf32>, vector<8x96xf32> -> vector<8x96xf32>
    %c0_13 = arith.constant 0 : index
    %c0_14 = arith.constant 0 : index
    %28 = vector.load %arg5[%c0_13, %c0_14] : memref<1x96xf32, #tpu.memory_space<vmem>>, vector<1x96xf32>
    %29 = vector.broadcast %28 : vector<1x96xf32> to vector<8x96xf32>
    %30 = arith.addf %27, %29 : vector<8x96xf32>
    %31 = vector.shape_cast %30 : vector<8x96xf32> to vector<1x8x96xf32>
    %cst_15 = arith.constant 0.000000e+00 : f32
    %32 = vector.broadcast %cst_15 : f32 to vector<8x32xf32>
    %33 = vector.extract_strided_slice %31 {offsets = [0, 0, 0], sizes = [1, 8, 8], strides = [1, 1, 1]} : vector<1x8x96xf32> to vector<1x8x8xf32>
    %34 = vector.extract_strided_slice %31 {offsets = [0, 0, 32], sizes = [1, 8, 8], strides = [1, 1, 1]} : vector<1x8x96xf32> to vector<1x8x8xf32>
    %35 = vector.extract_strided_slice %31 {offsets = [0, 0, 64], sizes = [1, 8, 8], strides = [1, 1, 1]} : vector<1x8x96xf32> to vector<1x8x8xf32>
    "tpu.trace_start"() <{level = 10 : i32, message = "bqd,bkd->bqk"}> : () -> ()
    %cst_16 = arith.constant dense<0.000000e+00> : vector<1x8x8xf32>
    %36 = tpu.matmul %33, %34, %cst_16 {dimension_numbers = #tpu.dot_dimension_numbers<[2], [2], [1], [1], [0, 0, 0, 1, 1, 1], [0], [0]>} : vector<1x8x8xf32>, vector<1x8x8xf32>, vector<1x8x8xf32> -> vector<1x8x8xf32>
    "tpu.trace_stop"() : () -> ()
    %cst_17 = arith.constant dense<0xFF800000> : vector<1x8xf32>
    %37 = vector.multi_reduction <maximumf>, %36, %cst_17 [2] : vector<1x8x8xf32> to vector<1x8xf32>
    %38 = vector.shape_cast %37 : vector<1x8xf32> to vector<1x8x1xf32>
    %39 = vector.broadcast %38 : vector<1x8x1xf32> to vector<1x8x8xf32>
    %40 = arith.subf %36, %39 : vector<1x8x8xf32>
    %41 = math.exp %40 : vector<1x8x8xf32>
    %cst_18 = arith.constant dense<0.000000e+00> : vector<1x8xf32>
    %42 = vector.multi_reduction <add>, %41, %cst_18 [2] : vector<1x8x8xf32> to vector<1x8xf32>
    %43 = vector.shape_cast %42 : vector<1x8xf32> to vector<1x8x1xf32>
    %44 = tpu.reciprocal %43 : vector<1x8x1xf32> -> vector<1x8x1xf32>
    %45 = vector.broadcast %44 : vector<1x8x1xf32> to vector<1x8x8xf32>
    %46 = arith.mulf %41, %45 : vector<1x8x8xf32>
    "tpu.trace_start"() <{level = 10 : i32, message = "bqk,bkd->bqd"}> : () -> ()
    %cst_19 = arith.constant dense<0.000000e+00> : vector<1x8x8xf32>
    %47 = tpu.matmul %46, %35, %cst_19 {dimension_numbers = #tpu.dot_dimension_numbers<[2], [1], [1], [2], [0, 0, 0, 1, 1, 2], [0], [0]>} : vector<1x8x8xf32>, vector<1x8x8xf32>, vector<1x8x8xf32> -> vector<1x8x8xf32>
    "tpu.trace_stop"() : () -> ()
    %48 = vector.shape_cast %47 : vector<1x8x8xf32> to vector<8x8xf32>
    %c0_20 = arith.constant 0 : index
    %c0_21 = arith.constant 0 : index
    %c0_22 = arith.constant 0 : index
    %49 = vector.load %arg6[%c0_20, %c0_21, %c0_22] : memref<4x8x32xf32, #tpu.memory_space<vmem>>, vector<1x8x32xf32>
    %50 = vector.shape_cast %49 : vector<1x8x32xf32> to vector<8x32xf32>
    %cst_23 = arith.constant dense<0.000000e+00> : vector<8x32xf32>
    %51 = tpu.matmul %48, %50, %cst_23 {dimension_numbers = #tpu.dot_dimension_numbers<[1], [0], [0], [1], [0, 0, 1, 1], [], []>} : vector<8x8xf32>, vector<8x32xf32>, vector<8x32xf32> -> vector<8x32xf32>
    %52 = arith.addf %32, %51 : vector<8x32xf32>
    %53 = vector.extract_strided_slice %31 {offsets = [0, 0, 8], sizes = [1, 8, 8], strides = [1, 1, 1]} : vector<1x8x96xf32> to vector<1x8x8xf32>
    %54 = vector.extract_strided_slice %31 {offsets = [0, 0, 40], sizes = [1, 8, 8], strides = [1, 1, 1]} : vector<1x8x96xf32> to vector<1x8x8xf32>
    %55 = vector.extract_strided_slice %31 {offsets = [0, 0, 72], sizes = [1, 8, 8], strides = [1, 1, 1]} : vector<1x8x96xf32> to vector<1x8x8xf32>
    "tpu.trace_start"() <{level = 10 : i32, message = "bqd,bkd->bqk"}> : () -> ()
    %cst_24 = arith.constant dense<0.000000e+00> : vector<1x8x8xf32>
    %56 = tpu.matmul %53, %54, %cst_24 {dimension_numbers = #tpu.dot_dimension_numbers<[2], [2], [1], [1], [0, 0, 0, 1, 1, 1], [0], [0]>} : vector<1x8x8xf32>, vector<1x8x8xf32>, vector<1x8x8xf32> -> vector<1x8x8xf32>
    "tpu.trace_stop"() : () -> ()
    %cst_25 = arith.constant dense<0xFF800000> : vector<1x8xf32>
    %57 = vector.multi_reduction <maximumf>, %56, %cst_25 [2] : vector<1x8x8xf32> to vector<1x8xf32>
    %58 = vector.shape_cast %57 : vector<1x8xf32> to vector<1x8x1xf32>
    %59 = vector.broadcast %58 : vector<1x8x1xf32> to vector<1x8x8xf32>
    %60 = arith.subf %56, %59 : vector<1x8x8xf32>
    %61 = math.exp %60 : vector<1x8x8xf32>
    %cst_26 = arith.constant dense<0.000000e+00> : vector<1x8xf32>
    %62 = vector.multi_reduction <add>, %61, %cst_26 [2] : vector<1x8x8xf32> to vector<1x8xf32>
    %63 = vector.shape_cast %62 : vector<1x8xf32> to vector<1x8x1xf32>
    %64 = tpu.reciprocal %63 : vector<1x8x1xf32> -> vector<1x8x1xf32>
    %65 = vector.broadcast %64 : vector<1x8x1xf32> to vector<1x8x8xf32>
    %66 = arith.mulf %61, %65 : vector<1x8x8xf32>
    "tpu.trace_start"() <{level = 10 : i32, message = "bqk,bkd->bqd"}> : () -> ()
    %cst_27 = arith.constant dense<0.000000e+00> : vector<1x8x8xf32>
    %67 = tpu.matmul %66, %55, %cst_27 {dimension_numbers = #tpu.dot_dimension_numbers<[2], [1], [1], [2], [0, 0, 0, 1, 1, 2], [0], [0]>} : vector<1x8x8xf32>, vector<1x8x8xf32>, vector<1x8x8xf32> -> vector<1x8x8xf32>
    "tpu.trace_stop"() : () -> ()
    %68 = vector.shape_cast %67 : vector<1x8x8xf32> to vector<8x8xf32>
    %c1 = arith.constant 1 : index
    %c0_28 = arith.constant 0 : index
    %c0_29 = arith.constant 0 : index
    %69 = vector.load %arg6[%c1, %c0_28, %c0_29] : memref<4x8x32xf32, #tpu.memory_space<vmem>>, vector<1x8x32xf32>
    %70 = vector.shape_cast %69 : vector<1x8x32xf32> to vector<8x32xf32>
    %cst_30 = arith.constant dense<0.000000e+00> : vector<8x32xf32>
    %71 = tpu.matmul %68, %70, %cst_30 {dimension_numbers = #tpu.dot_dimension_numbers<[1], [0], [0], [1], [0, 0, 1, 1], [], []>} : vector<8x8xf32>, vector<8x32xf32>, vector<8x32xf32> -> vector<8x32xf32>
    %72 = arith.addf %52, %71 : vector<8x32xf32>
    %73 = vector.extract_strided_slice %31 {offsets = [0, 0, 16], sizes = [1, 8, 8], strides = [1, 1, 1]} : vector<1x8x96xf32> to vector<1x8x8xf32>
    %74 = vector.extract_strided_slice %31 {offsets = [0, 0, 48], sizes = [1, 8, 8], strides = [1, 1, 1]} : vector<1x8x96xf32> to vector<1x8x8xf32>
    %75 = vector.extract_strided_slice %31 {offsets = [0, 0, 80], sizes = [1, 8, 8], strides = [1, 1, 1]} : vector<1x8x96xf32> to vector<1x8x8xf32>
    "tpu.trace_start"() <{level = 10 : i32, message = "bqd,bkd->bqk"}> : () -> ()
    %cst_31 = arith.constant dense<0.000000e+00> : vector<1x8x8xf32>
    %76 = tpu.matmul %73, %74, %cst_31 {dimension_numbers = #tpu.dot_dimension_numbers<[2], [2], [1], [1], [0, 0, 0, 1, 1, 1], [0], [0]>} : vector<1x8x8xf32>, vector<1x8x8xf32>, vector<1x8x8xf32> -> vector<1x8x8xf32>
    "tpu.trace_stop"() : () -> ()
    %cst_32 = arith.constant dense<0xFF800000> : vector<1x8xf32>
    %77 = vector.multi_reduction <maximumf>, %76, %cst_32 [2] : vector<1x8x8xf32> to vector<1x8xf32>
    %78 = vector.shape_cast %77 : vector<1x8xf32> to vector<1x8x1xf32>
    %79 = vector.broadcast %78 : vector<1x8x1xf32> to vector<1x8x8xf32>
    %80 = arith.subf %76, %79 : vector<1x8x8xf32>
    %81 = math.exp %80 : vector<1x8x8xf32>
    %cst_33 = arith.constant dense<0.000000e+00> : vector<1x8xf32>
    %82 = vector.multi_reduction <add>, %81, %cst_33 [2] : vector<1x8x8xf32> to vector<1x8xf32>
    %83 = vector.shape_cast %82 : vector<1x8xf32> to vector<1x8x1xf32>
    %84 = tpu.reciprocal %83 : vector<1x8x1xf32> -> vector<1x8x1xf32>
    %85 = vector.broadcast %84 : vector<1x8x1xf32> to vector<1x8x8xf32>
    %86 = arith.mulf %81, %85 : vector<1x8x8xf32>
    "tpu.trace_start"() <{level = 10 : i32, message = "bqk,bkd->bqd"}> : () -> ()
    %cst_34 = arith.constant dense<0.000000e+00> : vector<1x8x8xf32>
    %87 = tpu.matmul %86, %75, %cst_34 {dimension_numbers = #tpu.dot_dimension_numbers<[2], [1], [1], [2], [0, 0, 0, 1, 1, 2], [0], [0]>} : vector<1x8x8xf32>, vector<1x8x8xf32>, vector<1x8x8xf32> -> vector<1x8x8xf32>
    "tpu.trace_stop"() : () -> ()
    %88 = vector.shape_cast %87 : vector<1x8x8xf32> to vector<8x8xf32>
    %c2 = arith.constant 2 : index
    %c0_35 = arith.constant 0 : index
    %c0_36 = arith.constant 0 : index
    %89 = vector.load %arg6[%c2, %c0_35, %c0_36] : memref<4x8x32xf32, #tpu.memory_space<vmem>>, vector<1x8x32xf32>
    %90 = vector.shape_cast %89 : vector<1x8x32xf32> to vector<8x32xf32>
    %cst_37 = arith.constant dense<0.000000e+00> : vector<8x32xf32>
    %91 = tpu.matmul %88, %90, %cst_37 {dimension_numbers = #tpu.dot_dimension_numbers<[1], [0], [0], [1], [0, 0, 1, 1], [], []>} : vector<8x8xf32>, vector<8x32xf32>, vector<8x32xf32> -> vector<8x32xf32>
    %92 = arith.addf %72, %91 : vector<8x32xf32>
    %93 = vector.extract_strided_slice %31 {offsets = [0, 0, 24], sizes = [1, 8, 8], strides = [1, 1, 1]} : vector<1x8x96xf32> to vector<1x8x8xf32>
    %94 = vector.extract_strided_slice %31 {offsets = [0, 0, 56], sizes = [1, 8, 8], strides = [1, 1, 1]} : vector<1x8x96xf32> to vector<1x8x8xf32>
    %95 = vector.extract_strided_slice %31 {offsets = [0, 0, 88], sizes = [1, 8, 8], strides = [1, 1, 1]} : vector<1x8x96xf32> to vector<1x8x8xf32>
    "tpu.trace_start"() <{level = 10 : i32, message = "bqd,bkd->bqk"}> : () -> ()
    %cst_38 = arith.constant dense<0.000000e+00> : vector<1x8x8xf32>
    %96 = tpu.matmul %93, %94, %cst_38 {dimension_numbers = #tpu.dot_dimension_numbers<[2], [2], [1], [1], [0, 0, 0, 1, 1, 1], [0], [0]>} : vector<1x8x8xf32>, vector<1x8x8xf32>, vector<1x8x8xf32> -> vector<1x8x8xf32>
    "tpu.trace_stop"() : () -> ()
    %cst_39 = arith.constant dense<0xFF800000> : vector<1x8xf32>
    %97 = vector.multi_reduction <maximumf>, %96, %cst_39 [2] : vector<1x8x8xf32> to vector<1x8xf32>
    %98 = vector.shape_cast %97 : vector<1x8xf32> to vector<1x8x1xf32>
    %99 = vector.broadcast %98 : vector<1x8x1xf32> to vector<1x8x8xf32>
    %100 = arith.subf %96, %99 : vector<1x8x8xf32>
    %101 = math.exp %100 : vector<1x8x8xf32>
    %cst_40 = arith.constant dense<0.000000e+00> : vector<1x8xf32>
    %102 = vector.multi_reduction <add>, %101, %cst_40 [2] : vector<1x8x8xf32> to vector<1x8xf32>
    %103 = vector.shape_cast %102 : vector<1x8xf32> to vector<1x8x1xf32>
    %104 = tpu.reciprocal %103 : vector<1x8x1xf32> -> vector<1x8x1xf32>
    %105 = vector.broadcast %104 : vector<1x8x1xf32> to vector<1x8x8xf32>
    %106 = arith.mulf %101, %105 : vector<1x8x8xf32>
    "tpu.trace_start"() <{level = 10 : i32, message = "bqk,bkd->bqd"}> : () -> ()
    %cst_41 = arith.constant dense<0.000000e+00> : vector<1x8x8xf32>
    %107 = tpu.matmul %106, %95, %cst_41 {dimension_numbers = #tpu.dot_dimension_numbers<[2], [1], [1], [2], [0, 0, 0, 1, 1, 2], [0], [0]>} : vector<1x8x8xf32>, vector<1x8x8xf32>, vector<1x8x8xf32> -> vector<1x8x8xf32>
    "tpu.trace_stop"() : () -> ()
    %108 = vector.shape_cast %107 : vector<1x8x8xf32> to vector<8x8xf32>
    %c3 = arith.constant 3 : index
    %c0_42 = arith.constant 0 : index
    %c0_43 = arith.constant 0 : index
    %109 = vector.load %arg6[%c3, %c0_42, %c0_43] : memref<4x8x32xf32, #tpu.memory_space<vmem>>, vector<1x8x32xf32>
    %110 = vector.shape_cast %109 : vector<1x8x32xf32> to vector<8x32xf32>
    %cst_44 = arith.constant dense<0.000000e+00> : vector<8x32xf32>
    %111 = tpu.matmul %108, %110, %cst_44 {dimension_numbers = #tpu.dot_dimension_numbers<[1], [0], [0], [1], [0, 0, 1, 1], [], []>} : vector<8x8xf32>, vector<8x32xf32>, vector<8x32xf32> -> vector<8x32xf32>
    %112 = arith.addf %92, %111 : vector<8x32xf32>
    %113 = arith.addf %1, %112 : vector<8x32xf32>
    %c0_45 = arith.constant 0 : index
    %c0_46 = arith.constant 0 : index
    %114 = vector.load %arg7[%c0_45, %c0_46] : memref<1x32xf32, #tpu.memory_space<vmem>>, vector<1x32xf32>
    %115 = vector.broadcast %114 : vector<1x32xf32> to vector<8x32xf32>
    %116 = arith.addf %113, %115 : vector<8x32xf32>
    %c0_47 = arith.constant 0 : index
    %c0_48 = arith.constant 0 : index
    %117 = vector.load %arg8[%c0_47, %c0_48] : memref<1x32xf32, #tpu.memory_space<vmem>>, vector<1x32xf32>
    %c0_49 = arith.constant 0 : index
    %c0_50 = arith.constant 0 : index
    %118 = vector.load %arg9[%c0_49, %c0_50] : memref<1x32xf32, #tpu.memory_space<vmem>>, vector<1x32xf32>
    %cst_51 = arith.constant dense<0.000000e+00> : vector<8xf32>
    %119 = vector.multi_reduction <add>, %116, %cst_51 [1] : vector<8x32xf32> to vector<8xf32>
    %120 = vector.shape_cast %119 : vector<8xf32> to vector<8x1xf32>
    %cst_52 = arith.constant 3.200000e+01 : f32
    %121 = vector.broadcast %cst_52 : f32 to vector<8x1xf32>
    %122 = arith.divf %120, %121 : vector<8x1xf32>
    %123 = vector.broadcast %122 : vector<8x1xf32> to vector<8x32xf32>
    %124 = arith.subf %116, %123 : vector<8x32xf32>
    %125 = arith.mulf %124, %124 : vector<8x32xf32>
    %cst_53 = arith.constant dense<0.000000e+00> : vector<8xf32>
    %126 = vector.multi_reduction <add>, %125, %cst_53 [1] : vector<8x32xf32> to vector<8xf32>
    %127 = vector.shape_cast %126 : vector<8xf32> to vector<8x1xf32>
    %cst_54 = arith.constant 3.200000e+01 : f32
    %128 = vector.broadcast %cst_54 : f32 to vector<8x1xf32>
    %129 = arith.divf %127, %128 : vector<8x1xf32>
    %130 = vector.broadcast %122 : vector<8x1xf32> to vector<8x32xf32>
    %131 = arith.subf %116, %130 : vector<8x32xf32>
    %cst_55 = arith.constant 9.99999974E-6 : f32
    %132 = vector.broadcast %cst_55 : f32 to vector<8x1xf32>
    %133 = arith.addf %129, %132 : vector<8x1xf32>
    %134 = math.rsqrt %133 : vector<8x1xf32>
    %135 = vector.broadcast %134 : vector<8x1xf32> to vector<8x32xf32>
    %136 = arith.mulf %131, %135 : vector<8x32xf32>
    %137 = vector.broadcast %117 : vector<1x32xf32> to vector<8x32xf32>
    %138 = arith.mulf %136, %137 : vector<8x32xf32>
    %139 = vector.broadcast %118 : vector<1x32xf32> to vector<8x32xf32>
    %140 = arith.addf %138, %139 : vector<8x32xf32>
    %c0_56 = arith.constant 0 : index
    %c0_57 = arith.constant 0 : index
    %141 = vector.load %arg10[%c0_56, %c0_57] : memref<32x64xf32, #tpu.memory_space<vmem>>, vector<32x64xf32>
    %cst_58 = arith.constant dense<0.000000e+00> : vector<8x64xf32>
    %142 = tpu.matmul %140, %141, %cst_58 {dimension_numbers = #tpu.dot_dimension_numbers<[1], [0], [0], [1], [0, 0, 1, 1], [], []>} : vector<8x32xf32>, vector<32x64xf32>, vector<8x64xf32> -> vector<8x64xf32>
    %c0_59 = arith.constant 0 : index
    %c0_60 = arith.constant 0 : index
    %143 = vector.load %arg11[%c0_59, %c0_60] : memref<1x64xf32, #tpu.memory_space<vmem>>, vector<1x64xf32>
    %144 = vector.broadcast %143 : vector<1x64xf32> to vector<8x64xf32>
    %145 = arith.addf %142, %144 : vector<8x64xf32>
    %cst_61 = arith.constant 5.000000e-01 : f32
    %146 = vector.broadcast %cst_61 : f32 to vector<8x64xf32>
    %147 = arith.mulf %146, %145 : vector<8x64xf32>
    %cst_62 = arith.constant 0.707106769 : f32
    %148 = vector.broadcast %cst_62 : f32 to vector<8x64xf32>
    %149 = arith.mulf %145, %148 : vector<8x64xf32>
    %150 = math.erf %149 : vector<8x64xf32>
    %cst_63 = arith.constant 1.000000e+00 : f32
    %151 = vector.broadcast %cst_63 : f32 to vector<8x64xf32>
    %152 = arith.addf %151, %150 : vector<8x64xf32>
    %153 = arith.mulf %147, %152 : vector<8x64xf32>
    %c0_64 = arith.constant 0 : index
    %c0_65 = arith.constant 0 : index
    %154 = vector.load %arg12[%c0_64, %c0_65] : memref<64x32xf32, #tpu.memory_space<vmem>>, vector<64x32xf32>
    %cst_66 = arith.constant dense<0.000000e+00> : vector<8x32xf32>
    %155 = tpu.matmul %153, %154, %cst_66 {dimension_numbers = #tpu.dot_dimension_numbers<[1], [0], [0], [1], [0, 0, 1, 1], [], []>} : vector<8x64xf32>, vector<64x32xf32>, vector<8x32xf32> -> vector<8x32xf32>
    %c0_67 = arith.constant 0 : index
    %c0_68 = arith.constant 0 : index
    %156 = vector.load %arg13[%c0_67, %c0_68] : memref<1x32xf32, #tpu.memory_space<vmem>>, vector<1x32xf32>
    %157 = vector.broadcast %156 : vector<1x32xf32> to vector<8x32xf32>
    %158 = arith.addf %155, %157 : vector<8x32xf32>
    %159 = arith.addf %116, %158 : vector<8x32xf32>
    %160 = vector.shape_cast %159 : vector<8x32xf32> to vector<1x8x32xf32>
    %c0_69 = arith.constant 0 : index
    %c0_70 = arith.constant 0 : index
    %c0_71 = arith.constant 0 : index
    %161 = vector.load %arg14[%c0_69, %c0_70, %c0_71] : memref<1x8x32xf32, #tpu.memory_space<vmem>>, vector<1x8x32xf32>
    tpu.vector_store %arg14[%c0_69, %c0_70, %c0_71], %160 {strides = array<i32>} : memref<1x8x32xf32, #tpu.memory_space<vmem>>, vector<1x8x32xf32>,
    return
  }
  func.func @transform_0(%arg0: i32) -> (i32, i32, i32) {
    %c0_i32 = arith.constant 0 : i32
    %c0_i32_0 = arith.constant 0 : i32
    %c0_i32_1 = arith.constant 0 : i32
    return %arg0, %c0_i32, %c0_i32_0 : i32, i32, i32
  }
  func.func @transform_1(%arg0: i32) -> (i32, i32) {
    %c0_i32 = arith.constant 0 : i32
    %c0_i32_0 = arith.constant 0 : i32
    %c0_i32_1 = arith.constant 0 : i32
    return %c0_i32, %c0_i32_0 : i32, i32
  }
  func.func @transform_2(%arg0: i32) -> (i32, i32) {
    %c0_i32 = arith.constant 0 : i32
    %c0_i32_0 = arith.constant 0 : i32
    %c0_i32_1 = arith.constant 0 : i32
    return %c0_i32, %c0_i32_0 : i32, i32
  }
  func.func @transform_3(%arg0: i32) -> (i32, i32) {
    %c0_i32 = arith.constant 0 : i32
    %c0_i32_0 = arith.constant 0 : i32
    %c0_i32_1 = arith.constant 0 : i32
    return %c0_i32, %c0_i32_0 : i32, i32
  }
  func.func @transform_4(%arg0: i32) -> (i32, i32) {
    %c0_i32 = arith.constant 0 : i32
    %c0_i32_0 = arith.constant 0 : i32
    %c0_i32_1 = arith.constant 0 : i32
    return %c0_i32, %c0_i32_0 : i32, i32
  }
  func.func @transform_5(%arg0: i32) -> (i32, i32, i32) {
    %c0_i32 = arith.constant 0 : i32
    %c0_i32_0 = arith.constant 0 : i32
    %c0_i32_1 = arith.constant 0 : i32
    %c0_i32_2 = arith.constant 0 : i32
    return %c0_i32, %c0_i32_0, %c0_i32_1 : i32, i32, i32
  }
  func.func @transform_6(%arg0: i32) -> (i32, i32) {
    %c0_i32 = arith.constant 0 : i32
    %c0_i32_0 = arith.constant 0 : i32
    %c0_i32_1 = arith.constant 0 : i32
    return %c0_i32, %c0_i32_0 : i32, i32
  }
  func.func @transform_7(%arg0: i32) -> (i32, i32) {
    %c0_i32 = arith.constant 0 : i32
    %c0_i32_0 = arith.constant 0 : i32
    %c0_i32_1 = arith.constant 0 : i32
    return %c0_i32, %c0_i32_0 : i32, i32
  }
  func.func @transform_8(%arg0: i32) -> (i32, i32) {
    %c0_i32 = arith.constant 0 : i32
    %c0_i32_0 = arith.constant 0 : i32
    %c0_i32_1 = arith.constant 0 : i32
    return %c0_i32, %c0_i32_0 : i32, i32
  }
  func.func @transform_9(%arg0: i32) -> (i32, i32) {
    %c0_i32 = arith.constant 0 : i32
    %c0_i32_0 = arith.constant 0 : i32
    %c0_i32_1 = arith.constant 0 : i32
    return %c0_i32, %c0_i32_0 : i32, i32
  }
  func.func @transform_10(%arg0: i32) -> (i32, i32) {
    %c0_i32 = arith.constant 0 : i32
    %c0_i32_0 = arith.constant 0 : i32
    %c0_i32_1 = arith.constant 0 : i32
    return %c0_i32, %c0_i32_0 : i32, i32
  }
  func.func @transform_11(%arg0: i32) -> (i32, i32) {
    %c0_i32 = arith.constant 0 : i32
    %c0_i32_0 = arith.constant 0 : i32
    %c0_i32_1 = arith.constant 0 : i32
    return %c0_i32, %c0_i32_0 : i32, i32
  }
  func.func @transform_12(%arg0: i32) -> (i32, i32) {
    %c0_i32 = arith.constant 0 : i32
    %c0_i32_0 = arith.constant 0 : i32
    %c0_i32_1 = arith.constant 0 : i32
    return %c0_i32, %c0_i32_0 : i32, i32
  }
  func.func @transform_13(%arg0: i32) -> (i32, i32, i32) {
    %c0_i32 = arith.constant 0 : i32
    %c0_i32_0 = arith.constant 0 : i32
    %c0_i32_1 = arith.constant 0 : i32
    return %arg0, %c0_i32, %c0_i32_0 : i32, i32, i32
  }
}

</mosaic_0001>

<bundles_post_ra>
// kernel: tpu_custom_call.1
= control target key start
LH: loop header
LB: loop body
LE: loop exit
PB: predicated region body
PF: predicated region fallthrough
CT: control target
= control target key end

     0   :  { %s1853_s0 = inlined_call_operand.hbm [shape: f32[2,8,32], index: 0, kind: input, shape index: {}]   ;;  %s1854_s1 = inlined_call_operand.hbm [shape: f32[1,32], index: 1, kind: input, shape index: {}]   ;;  %s1855_s2 = inlined_call_operand.vmem [shape: f32[1,32], index: 2, kind: input, shape index: {}]   ;;  %s1856_s3 = inlined_call_operand.vmem [shape: f32[32,96], index: 3, kind: input, shape index: {}]   ;;  %s1857_s4 = inlined_call_operand.vmem [shape: f32[1,96], index: 4, kind: input, shape index: {}]   ;;  %s1858_s5 = inlined_call_operand.vmem [shape: f32[4,8,32], index: 5, kind: input, shape index: {}]   ;;  %s1859_s6 = inlined_call_operand.vmem [shape: f32[1,32], index: 6, kind: input, shape index: {}]   ;;  %s1860_s7 = inlined_call_operand.vmem [shape: f32[1,32], index: 7, kind: input, shape index: {}]   ;;  %s1861_s8 = inlined_call_operand.vmem [shape: f32[1,32], index: 8, kind: input, shape index: {}]   ;;  %s1862_s9 = inlined_call_operand.vmem [shape: f32[32,64], index: 9, kind: input, shape index: {}]   ;;  %s1863_s10 = inlined_call_operand.vmem [shape: f32[1,64], index: 10, kind: input, shape index: {}]   ;;  %s1864_s11 = inlined_call_operand.vmem [shape: f32[64,32], index: 11, kind: input, shape index: {}]   ;;  %s1865_s12 = inlined_call_operand.vmem [shape: f32[1,32], index: 12, kind: input, shape index: {}]   ;;  %s1866_s13 = inlined_call_operand.hbm [shape: f32[2,8,32], index: 13, kind: output, shape index: {}]  }
   0x1   :  { %1874 = sst [smem:[#allocation17_spill]] %s1854_s1 }
   0x2   :  { %18 = vsyncpa [#allocation3], 0 }
   0x3   :  { %20 = vsyncpa [#allocation3 + $0x1], 0 }
   0x4   :  { %21 = vsyncpa [#allocation6], 0 }
   0x5   :  { %22 = vsyncpa [#allocation4], 0 }
   0x6   :  { %24 = vsyncpa [#allocation4 + $0x1], 0  ;;  %s1558_s25 = smov 0   ;;  %s1560_s26 = smov 0  }
   0x7   :  { %s1562_s27 = smov 0   ;;  %s1564_s28 = smov 0  }
   0x8 LB: > { %1875 = sst [smem:[#allocation11_spill]] %s1461_s25  ;;  %s1579_s29 = sadd.s32 4294967295, %s1473_s28   ;;  %s1473_s28 = sphi %s1564_s28, %s1891_s28   ;;  %s1469_s27 = sphi %s1562_s27, %s1893_s27   ;;  %s1465_s26 = sphi %s1560_s26, %s1895_s26   ;;  %s1461_s25 = sphi %s1558_s25, %s1894_s25  }
   0x9   : > { %1876 = sst [smem:[#allocation12_spill]] %s1469_s27  ;;  %s1205_s30 = sadd.s32 4294967294, %s1473_s28  }
   0xa   : > { %p50_p0 = scmp.ne.s32.totalorder %s1465_s26, %s1461_s25  ;;  %p51_p1 = scmp.eq.s32.totalorder %s1579_s29, 0 }
   0xb   : > { %p326_p2 = scmp.eq.s32.totalorder %s1579_s29, 1  ;;  %p332_p3 = scmp.eq.s32.totalorder %s1205_s30, 1 }
   0xc   : > { %p1588_p4 = por %p51_p1, %p50_p0  ;;  %p1206_p5 = scmp.ge.s32.totalorder %s1473_s28, 1 }
   0xd   : > { %p1593_p6 = por %p332_p3, %p50_p0  ;;  %p339_p7 = scmp.lt.s32.totalorder %s1473_s28, 3 }
   0xe   : > { %s1880_s1 = sld [smem:[#allocation17_spill]]  ;;  %s1475_s20 = smov [#allocation5]  }
   0xf   : > { %s1878_s15 = scalar_select %p1593_p6, 1, 0 }
  0x10   : > { %p1601_p8 = pnand %p1206_p5, %p339_p7  ;;  %s353_s21 = sshll.u32 %s1475_s20, 4  ;;  %s354_s21 = int_to_ptr.vmem [resolvable:$true] %s353_s21 }
  0x11   : > { %1879 = sst [smem:[#allocation13_spill]] %s1878_s15  ;;  %s1611_s22 = sadd.s32 1, %s1473_s28  }
  0x12   : > { %p1250_p10 = pneg %p1601_p8  ;;  %1882 = sst [smem:[#allocation14_spill]] %s1611_s22 }
  0x13   : > { %s37_s23 = sadd.s32 1, %s1469_s27  ;;  %s34_s24 = ssub.s32 %s1473_s28, %s1611_s22 }
  0x14   : > { %s351_s18 = sshll.u32 %s1880_s1, 4  ;;  %p1251_p11 = pnand %p1250_p10, %p51_p1  ;;  %s352_s18 = int_to_ptr.hbm [resolvable:$true] %s351_s18 }
  0x15   : > { %p35_p12 = scmp.eq.s32.totalorder %s34_s24, 0  ;;  %p44_p13 = scmp.ne.s32.totalorder %s1469_s27, %s1465_s26 }
  0x16   : > { %1253 = dma.hbm_to_vmem [thread:$0]  (!%p1251_p11), %s352_s18, 16, %s354_s21, [#allocation6]  }
  0x17   : > { %p45_p0 = scmp.eq.s32.totalorder %s1473_s28, 0  ;;  %p1624_p3 = por %p326_p2, %p44_p13 }
  0x18   : > { %s1620_s30 = scalar_select %p35_p12, %s1469_s27, %s37_s23  }
  0x19   : > { %s1884_s16 = scalar_select %p1624_p3, 1, 0 }
  0x1a   : > { %1883 = sst [smem:[#allocation15_spill]] %s1620_s30  ;;  %p1263_p5 = scmp.lt.s32.totalorder %s1473_s28, 2 }
  0x1b   : > { %1885 = sst [smem:[#allocation16_spill]] %s1884_s16  ;;  %s397_s17 = sand.u32 1, %s1469_s27  }
  0x1c   : > { %s1210_s20 = sshll.u32 %s1473_s28, 3  ;;  %p46_p7 = por %p45_p0, %p44_p13 }
  0x1d   : > { %s1209_s1 = sshll.u32 %s397_s17, 3  ;;  %s405_s22 = scalar_lea.hbm %s1853_s0, %s1210_s20 }
  0x1e   : > { %s407_s18 = sshll.u32 %s405_s22, 4  ;;  %s401_s21 = scalar_lea.vmem [#allocation2], %s1209_s1  ;;  %s408_s18 = int_to_ptr.hbm [resolvable:$true] %s407_s18 }
  0x1f   : > { %s409_s24 = sshll.u32 %s401_s21, 4  ;;  %p1634_p10 = pnand %p1263_p5, %p46_p7  ;;  %s410_s24 = int_to_ptr.vmem [resolvable:$true] %s409_s24 }
  0x20   : > { %s398_s30 = scalar_lea.sflag [#allocation3], %s397_s17  ;;  %s1373_s16 = sshra.s32 %s408_s18, 4  ;;  %s1374_s16 = int_to_ptr.hbm [resolvable:$true] %s1373_s16 }
  0x21   : > { %s1375_s27 = scalar_lea.hbm %s1374_s16, 8  ;;  %p1377_p11 = pneg %p1634_p10 }
  0x22   : > { %p1376_p2 = scmp.ne.s32.totalorder %s1374_s16, %s1375_s27  ;;  %s1380_s1 = scalar_lea.hbm %s1853_s0, 16 }
  0x23   : > { %p1381_p0 = scmp.lt.s32.totalorder %s1374_s16, %s1853_s0  ;;  %p1382_p5 = scmp.lt.s32.totalorder %s1380_s1, %s1375_s27 }
  0x24   : > { %p1378_p12 = pnand %p1377_p11, %p1376_p2 }
  0x25   : > { %p1383_p7 = por %p1382_p5, %p1381_p0 }
  0x26   : > { %p1379_p13 = pneg %p1378_p12 }
  0x28   : > { %p1384_p9 = pnand %p1383_p7, %p1379_p13 }
  0x2a   : > { %1387 = shalt.err (!%p1384_p9)
}
  0x2b   : > { %1257 = dma.hbm_to_vmem [thread:$0]  (!%p1634_p10), %s408_s18, 128, %s410_s24, %s398_s30  }
  0x2c   : > { %418 = sbr.rel (%p1601_p8) target bundleno = 2359 (0x937), region = 72  ;;  %s1651_s17 = sand.u32 (!%p1601_p8), 1, %s1465_s26  }
  0x2d   : > { %s1212_s21 = sshll.u32 (!%p1601_p8), %s1651_s17, 3  ;;  %s421_s25 = scalar_lea.sflag (!%p1601_p8), [#allocation3], %s1651_s17 }
  0x2e   : > { %s424_s27 = scalar_lea.vmem (!%p1601_p8), [#allocation2], %s1212_s21 }
  0x31   : > { %1448 = dma.done.wait (%p1588_p4), %s421_s25, 128  }
  0x32   : > { %1450 = vsyncadd (%p1588_p4), %s421_s25, 4294967168 }
  0x33   : > { %1452 = dma.done.wait (%p51_p1), [#allocation6], 16  }
  0x34   : > { %1454 = vsyncadd (%p51_p1), [#allocation6], 4294967280  ;;  %vm476_vm0 = vcmask 261120   ;;  %v1665_v0 = vld [vmem:[%s424_s27] sm:$0xff]  ;;  %v1476_v2 = vmov 32.0   ;;  %v517_v14 = vld [vmem:[%s1856_s3 + $0x18] sm:$0xff] }
  0x35   : > { %v477_v1 = vsel %vm476_vm0, %v1665_v0, 0.0  ;;  %1319 = vrcp.f32 %v1476_v2  ;;  %537 = vmatpush.msra.mxu0 %v517_v14  ;;  %v516_v15 = vld [vmem:[%s1856_s3 + $0x10] sm:$0xff]  ;;  %v515_v16 = vld [vmem:[%s1856_s3 + $0x8] sm:$0xff]  ;;  %v514_v17 = vld [vmem:[%s1856_s3] sm:$0xff]  ;;  %s1477_s27 = smov 88   ;;  %s1478_s14 = smov 96  }
  0x36   : > { %478 = vadd.xlane.f32.xlu0 %v477_v1  ;;  %v1311_v27 = vld [vmem:[#allocation5] ss:$0 sm:$0xff]  ;;  %v1312_v30 = vld [vmem:[%s1855_s2] ss:$0 sm:$0xff]  ;;  %s1479_s19 = smov 72   ;;  %s1480_s30 = smov 80  }
  0x37   : > { %538 = vmatpush.msra.mxu0 %v516_v15  ;;  %v1313_v33 = vld [vmem:[%s1857_s4] ss:$0 sm:$0xff]  ;;  %vm548_vm5 = vcmask 64512   ;;  %s1481_s24 = smov 64   ;;  %s1482_s23 = smov 120  }
  0x38   : > { %v623_v36 = vld [vmem:[%s1858_s5] sm:$0xff]  ;;  %s1483_s15 = smov 104   ;;  %s1484_s1 = smov 112  }
  0x39   : > { %539 = vmatpush.msra.mxu0 %v515_v16  ;;  %745 = vmatpush.msra.mxu3 %v623_v36  ;;  %s1485_s22 = smov 48   ;;  %s1486_s20 = smov 40  }
  0x3a   : > { %s1487_s25 = smov 56  }
  0x3b   : > { %v1320_v3 = vpop.eup %1319  ;;  %540 = vmatpush.msra.mxu0 %v514_v17 }
  0x3c   : > { %v481_v4 = vmul.f32 32.0, %v1320_v3  ;;  %vm485_vm1 = vweird.f32 %v1320_v3 }
  0x3e   : > { %v482_v5 = vsub.f32 1.0, %v481_v4 }
  0x40   : > { %v483_v6 = vmul.f32 %v1320_v3, %v482_v5 }
  0x42   : > { %v484_v7 = vadd.f32 %v1320_v3, %v483_v6 }
  0x44   : > { %v1669_v8 = vsel %vm485_vm1, %v1320_v3, %v484_v7 }
  0xa9   : > { %v479_v9 = vpop.xlane.xlu0 %478 }
  0xaa   : > { %v487_v10 = vmul.f32 %v1669_v8, %v479_v9 }
  0xac   : > { %v488_v11 = vsub.f32 %v1665_v0, %v487_v10 }
  0xae   : > { %v489_v12 = vmul.f32 %v488_v11, %v488_v11 }
  0xb0   : > { %v490_v13 = vsel %vm476_vm0, %v489_v12, 0.0 }
  0xb1   : > { %491 = vadd.xlane.f32.xlu0 %v490_v13 }
 0x124   : > { %v492_v18 = vpop.xlane.xlu0 %491 }
 0x125   : > { %v493_v19 = vmul.f32 %v492_v18, %v1669_v8 }
 0x127   : > { %v494_v20 = vadd.f32 1e-05, %v493_v19 }
 0x129   : > { %1321 = vrsqrt.f32 %v494_v20  ;;  %vm501_vm3 = vweird.f32 %v494_v20 }
 0x12f   : > { %v1322_v21 = vpop.eup %1321 }
 0x130   : > { %v496_v22 = vmul.f32 %v1322_v21, %v494_v20  ;;  %vm502_vm2 = vweird.f32 %v1322_v21 }
 0x131   : > { %vm503_vm4 = vmor %vm501_vm3, %vm502_vm2 }
 0x132   : > { %v497_v23 = vmul.f32 %v1322_v21, %v496_v22 }
 0x134   : > { %v498_v24 = vmul.f32 0.5, %v497_v23 }
 0x136   : > { %v499_v25 = vsub.f32 1.5, %v498_v24 }
 0x138   : > { %v500_v26 = vmul.f32 %v1322_v21, %v499_v25 }
 0x13a   : > { %v504_v28 = vsel %vm503_vm4, %v1322_v21, %v500_v26 }
 0x13b   : > { %v505_v29 = vmul.f32 %v504_v28, %v488_v11 }
 0x13d   : > { %v509_v31 = vmul.f32 %v1311_v27, %v505_v29 }
 0x13f   : > { %v513_v32 = vadd.f32 %v1312_v30, %v509_v31 }
 0x141   : > { %1215 = vmatmul.msk.f32.vlgmr.msra.gmra.mxu0 %vm476_vm0, %v513_v32 }
 0x1be   : > { %v542_v34 = vpop.f32.mrf.mxu0 }
 0x1bf   : > { %v1694_v35 = vadd.f32 %v1313_v33, %v542_v34 }
 0x1c1   : > { %626 = vrot.lane.b32.xlu0 %v1694_v35, %s1477_s27  ;;  %546 = vrot.lane.b32.xlu1 %v1694_v35, %s1478_s14 }
 0x1c9   : > { %856 = vrot.lane.b32.xlu0 %v1694_v35, %s1479_s19 }
 0x1d1   : > { %752 = vrot.lane.b32.xlu0 %v1694_v35, %s1480_s30 }
 0x233   : > { %v627_v37 = vpop.permute.xlu0 %626  ;;  %v547_v38 = vpop.permute.xlu1 %546 }
 0x234   : > { %1216 = vmatpush.xpose.msk.msra.mxu1 %vm548_vm5, %v547_v38  ;;  %1219 = vmatpush.xpose.msk.msrb.mxu0 %vm548_vm5, %v627_v37 }
 0x237   : > { %1217 = vmatmul.msk.f32.vlgmr.msra.gmra.mxu1 %vm548_vm5, %v1694_v35 }
 0x23b   : > { %v857_v39 = vpop.permute.xlu0 %856 }
 0x23c   : > { %1230 = vmatpush.xpose.msk.msrb.mxu3 %vm548_vm5, %v857_v39 }
 0x243   : > { %v753_v40 = vpop.permute.xlu0 %752 }
 0x244   : > { %1225 = vmatpush.xpose.msk.msra.mxu0 %vm548_vm5, %v753_v40 }
 0x2b4   : > { %v570_v41 = vpop.f32.mrf.mxu1 }
 0x2b5   : > { %v573_v42 = vsel %vm548_vm5, %v570_v41, -inf }
 0x2b6   : > { %574 = vmax.xlane.f32.xlu1 %v573_v42 }
 0x329   : > { %v575_v43 = vpop.xlane.xlu1 %574 }
 0x32a   : > { %v576_v44 = vsub.f32 %v570_v41, %v575_v43 }
 0x32c   : > { %v577_v45 = vmul.f32 1.442695, %v576_v44 }
 0x32e   : > { %1323 = vpow2.f32 %v577_v45 }
 0x334   : > { %v1324_v46 = vpop.eup %1323 }
 0x335   : > { %v579_v47 = vsel %vm548_vm5, %v1324_v46, 0.0 }
 0x336   : > { %580 = vadd.xlane.f32.xlu2 %v579_v47 }
 0x34e   : > { %597 = vrot.lane.b32.xlu2 %v1694_v35, %s1481_s24  ;;  %s472_s24 = scalar_lea.vmem [#allocation7], %s1212_s21  ;;  %s1423_s21 = scalar_lea.hbm %s1866_s13, 16 }
 0x356   : > { %624 = vrot.lane.b32.xlu2 %v1694_v35, %s1482_s23  ;;  %s1122_s23 = sshll.u32 %s472_s24, 4  ;;  %s1123_s23 = int_to_ptr.vmem [resolvable:$true] %s1122_s23 }
 0x35e   : > { %854 = vrot.lane.b32.xlu2 %v1694_v35, %s1483_s15 }
 0x366   : > { %750 = vrot.lane.b32.xlu2 %v1694_v35, %s1484_s1 }
 0x3a9   : > { %v581_v48 = vpop.xlane.xlu2 %580 }
 0x3aa   : > { %1325 = vrcp.f32 %v581_v48  ;;  %v593_v53 = vand.u32 2147483648, %v581_v48  ;;  %v591_v55 = vand.u32 2147483647, %v581_v48  ;;  %vm587_vm7 = vweird.f32 %v581_v48 }
 0x3ac   : > { %v594_v57 = vor.u32 1.1754944e-38, %v593_v53  ;;  %vm592_vm9 = vcmp.eq.f32.partialorder %v591_v55, 8.507059e+37 }
 0x3b0   : > { %v1326_v49 = vpop.eup %1325 }
 0x3b1   : > { %v583_v50 = vmul.f32 %v1326_v49, %v581_v48  ;;  %v598_v51 = vpop.permute.xlu2 %597  ;;  %vm588_vm6 = vweird.f32 %v1326_v49 }
 0x3b2   : > { %618 = vmatpush.msra.mxu2 %v598_v51  ;;  %vm589_vm8 = vmor %vm587_vm7, %vm588_vm6 }
 0x3b3   : > { %v584_v52 = vsub.f32 1.0, %v583_v50 }
 0x3b5   : > { %v585_v54 = vmul.f32 %v1326_v49, %v584_v52 }
 0x3b7   : > { %v586_v56 = vadd.f32 %v1326_v49, %v585_v54 }
 0x3b9   : > { %v625_v58 = vpop.permute.xlu2 %624  ;;  %v590_v59 = vsel %vm589_vm8, %v1326_v49, %v586_v56 }
 0x3ba   : > { %1220 = vmatmul.msk.f32.vlgmr.msrb.gmra.mxu0 %vm548_vm5, %v625_v58  ;;  %v595_v60 = vsel %vm592_vm9, %v594_v57, %v590_v59 }
 0x3bb   : > { %v596_v61 = vmul.f32 %v1324_v46, %v595_v60 }
 0x3bd   : > { %1218 = vmatmul.msk.f32.vlgmr.msra.gmra.mxu2 %vm548_vm5, %v596_v61 }
 0x3c1   : > { %v855_v62 = vpop.permute.xlu2 %854 }
 0x3c9   : > { %v751_v63 = vpop.permute.xlu2 %750 }
 0x3ca   : > { %1226 = vmatmul.msk.f32.vlgmr.msra.gmra.mxu0 %vm548_vm5, %v751_v63 }
 0x437   : > { %v649_v1 = vpop.f32.mrf.mxu0 }
 0x438   : > { %v652_v2 = vsel %vm548_vm5, %v649_v1, -inf }
 0x439   : > { %653 = vmax.xlane.f32.xlu1 %v652_v2  ;;  %v1222_v2 = vld [vmem:[%s1858_s5 + $0x8] sm:$0xff] }
 0x43a   : > { %722 = vmatpush.msrb.mxu1 %v1222_v2 }
 0x440   : > { %v620_v3 = vpop.f32.mrf.mxu2 }
 0x441   : > { %1224 = vmatmul.msk.f32.vlgmr.msra.gmra.mxu3 %vm548_vm5, %v620_v3  ;;  %v1228_v3 = vld [vmem:[%s1858_s5 + $0x10] sm:$0xff] }
 0x442   : > { %848 = vmatpush.msra.mxu1 %v1228_v3 }
 0x447   : > { %v775_v4 = vpop.f32.mrf.mxu0 }
 0x448   : > { %v778_v5 = vsel %vm548_vm5, %v775_v4, -inf }
 0x449   : > { %1231 = vmatmul.msk.f32.vlgmr.msrb.gmra.mxu3 %vm548_vm5, %v855_v62  ;;  %779 = vmax.xlane.f32.xlu0 %v778_v5 }
 0x45d   : > { %802 = vrot.lane.b32.xlu0 %v1694_v35, %s1485_s22 }
 0x4ac   : > { %v654_v6 = vpop.xlane.xlu1 %653 }
 0x4ad   : > { %v655_v7 = vsub.f32 %v649_v1, %v654_v6  ;;  %v1233_v1 = vld [vmem:[%s1858_s5 + $0x18] sm:$0xff] }
 0x4af   : > { %v656_v9 = vmul.f32 1.442695, %v655_v7 }
 0x4b1   : > { %1327 = vpow2.f32 %v656_v9 }
 0x4b7   : > { %v1723_v10 = vpop.eup %1327 }
 0x4b8   : > { %v658_v11 = vsel %vm548_vm5, %v1723_v10, 0.0 }
 0x4b9   : > { %659 = vadd.xlane.f32.xlu1 %v658_v11 }
 0x4bc   : > { %v780_v12 = vpop.xlane.xlu0 %779 }
 0x4bd   : > { %v781_v13 = vsub.f32 %v775_v4, %v780_v12 }
 0x4bf   : > { %v782_v14 = vmul.f32 1.442695, %v781_v13 }
 0x4c1   : > { %1329 = vpow2.f32 %v782_v14  ;;  %v1314_v14 = vld [vmem:[%s1859_s6] ss:$0 sm:$0xff] }
 0x4c4   : > { %v1727_v15 = vpop.f32.mrf.mxu3 }
 0x4c7   : > { %v1729_v16 = vpop.eup %1329 }
 0x4c8   : > { %v784_v17 = vsel %vm548_vm5, %v1729_v16, 0.0 }
 0x4c9   : > { %785 = vadd.xlane.f32.xlu1 %v784_v17 }
 0x4cc   : > { %v879_v18 = vpop.f32.mrf.mxu3 }
 0x4cd   : > { %v882_v19 = vsel %vm548_vm5, %v879_v18, -inf }
 0x4ce   : > { %883 = vmax.xlane.f32.xlu2 %v882_v19 }
 0x4cf   : > { %v803_v59 = vpop.permute.xlu0 %802 }
 0x4e6   : > { %906 = vrot.lane.b32.xlu2 %v1694_v35, %s1486_s20 }
 0x52c   : > { %v660_v26 = vpop.xlane.xlu1 %659 }
 0x52d   : > { %v672_v44 = vand.u32 2147483648, %v660_v26  ;;  %vm666_vm14 = vweird.f32 %v660_v26  ;;  %v670_v46 = vand.u32 2147483647, %v660_v26 }
 0x52f   : > { %v673_v52 = vor.u32 1.1754944e-38, %v672_v44  ;;  %vm671_vm2 = vcmp.eq.f32.partialorder %v670_v46, 8.507059e+37  ;;  %v1078_v46 = vld [vmem:[%s1864_s11 + $0x38] sm:$0xff] }
 0x530   : > { %1095 = vmatpush.msra.mxu3 %v1078_v46 }
 0x53c   : > { %v786_v27 = vpop.xlane.xlu1 %785 }
 0x53d   : > { %v798_v55 = vand.u32 2147483648, %v786_v27  ;;  %vm792_vm4 = vweird.f32 %v786_v27  ;;  %v796_v56 = vand.u32 2147483647, %v786_v27 }
 0x53f   : > { %v799_v61 = vor.u32 1.1754944e-38, %v798_v55  ;;  %vm797_vm7 = vcmp.eq.f32.partialorder %v796_v56, 8.507059e+37  ;;  %v1075_v55 = vld [vmem:[%s1864_s11 + $0x20] sm:$0xff] }
 0x541   : > { %v884_v20 = vpop.xlane.xlu2 %883 }
 0x542   : > { %v885_v21 = vsub.f32 %v879_v18, %v884_v20 }
 0x544   : > { %v886_v22 = vmul.f32 1.442695, %v885_v21 }
 0x546   : > { %1331 = vpow2.f32 %v886_v22 }
 0x547   : > { %1333 = vrcp.f32 %v660_v26 }
 0x548   : > { %1335 = vrcp.f32 %v786_v27 }
 0x549   : > { %v907_v23 = vpop.permute.xlu2 %906 }
 0x54a   : > { %927 = vmatpush.msrb.mxu0 %v907_v23  ;;  %v999_v23 = vld [vmem:[%s1862_s9 + $0x18] sm:$0xff] }
 0x54c   : > { %v1332_v24 = vpop.eup %1331 }
 0x54d   : > { %v888_v25 = vsel %vm548_vm5, %v1332_v24, 0.0  ;;  %v1334_v28 = vpop.eup %1333 }
 0x54e   : > { %889 = vadd.xlane.f32.xlu1 %v888_v25  ;;  %v662_v30 = vmul.f32 %v1334_v28, %v660_v26  ;;  %v1336_v31 = vpop.eup %1335  ;;  %vm667_vm11 = vweird.f32 %v1334_v28  ;;  %v996_v25 = vld [vmem:[%s1862_s9] sm:$0xff] }
 0x54f   : > { %v788_v37 = vmul.f32 %v1336_v31, %v786_v27  ;;  %vm668_vm1 = vmor %vm666_vm14, %vm667_vm11  ;;  %vm793_vm3 = vweird.f32 %v1336_v31  ;;  %vm1083_vm14 = vcmask 523264  }
 0x550   : > { %v663_v32 = vsub.f32 1.0, %v662_v30  ;;  %vm794_vm6 = vmor %vm792_vm4, %vm793_vm3 }
 0x551   : > { %v789_v42 = vsub.f32 1.0, %v788_v37 }
 0x552   : > { %v664_v36 = vmul.f32 %v1334_v28, %v663_v32 }
 0x553   : > { %v790_v49 = vmul.f32 %v1336_v31, %v789_v42 }
 0x555   : > { %v791_v54 = vadd.f32 %v1336_v31, %v790_v49  ;;  %v1077_v49 = vld [vmem:[%s1864_s11 + $0x30] sm:$0xff] }
 0x556   : > { %1096 = vmatpush.msra.mxu3 %v1077_v49 }
 0x557   : > { %v795_v60 = vsel %vm794_vm6, %v1336_v31, %v791_v54 }
 0x558   : > { %v800_v62 = vsel %vm797_vm7, %v799_v61, %v795_v60  ;;  %v1073_v60 = vld [vmem:[%s1864_s11 + $0x10] sm:$0xff] }
 0x559   : > { %v801_v63 = vmul.f32 %v1729_v16, %v800_v62  ;;  %v1072_v62 = vld [vmem:[%s1864_s11 + $0x8] sm:$0xff] }
 0x567   : > { %676 = vrot.lane.b32.xlu1 %v1694_v35, %s1487_s25  ;;  %v665_v35 = vadd.f32 %v1334_v28, %v664_v36  ;;  %v1315_v36 = vld [vmem:[%s1860_s7] ss:$0 sm:$0xff]  ;;  %s1239_s25 = sshll.u32 %s1579_s29, 3  ;;  %s1110_s29 = scalar_lea.sflag [#allocation4], %s1651_s17 }
 0x568   : > { %s1120_s18 = scalar_lea.hbm %s1866_s13, %s1239_s25 }
 0x569   : > { %v669_v51 = vsel %vm668_vm1, %v1334_v28, %v665_v35  ;;  %s1124_s15 = sshll.u32 %s1120_s18, 4  ;;  %s1125_s15 = int_to_ptr.hbm [resolvable:$true] %s1124_s15 }
 0x56a   : > { %v674_v53 = vsel %vm671_vm2, %v673_v52, %v669_v51  ;;  %v1076_v52 = vld [vmem:[%s1864_s11 + $0x28] sm:$0xff]  ;;  %s1417_s1 = sshra.s32 %s1125_s15, 4  ;;  %s1418_s1 = int_to_ptr.hbm [resolvable:$true] %s1417_s1 }
 0x56b   : > { %v675_v58 = vmul.f32 %v1723_v10, %v674_v53  ;;  %1097 = vmatpush.msra.mxu3 %v1076_v52  ;;  %s1419_s22 = scalar_lea.hbm %s1418_s1, 8  ;;  %p1424_p9 = scmp.lt.s32.totalorder %s1418_s1, %s1866_s13 }
 0x56c   : > { %p1420_p1 = scmp.ne.s32.totalorder %s1418_s1, %s1419_s22  ;;  %p1425_p10 = scmp.lt.s32.totalorder %s1423_s21, %s1419_s22 }
 0x56d   : > { %1098 = vmatpush.msra.mxu3 %v1075_v55 }
 0x56e   : > { %p1421_p4 = pnand %p1420_p1, %p1624_p3  ;;  %p1426_p2 = por %p1425_p10, %p1424_p9 }
 0x570   : > { %p1422_p8 = pneg %p1421_p4 }
 0x572   : > { %p1427_p11 = pnand %p1426_p2, %p1422_p8 }
 0x5c1   : > { %v890_v29 = vpop.xlane.xlu1 %889 }
 0x5c2   : > { %1337 = vrcp.f32 %v890_v29  ;;  %v902_v39 = vand.u32 2147483648, %v890_v29  ;;  %v900_v41 = vand.u32 2147483647, %v890_v29  ;;  %vm896_vm12 = vweird.f32 %v890_v29 }
 0x5c4   : > { %v903_v45 = vor.u32 1.1754944e-38, %v902_v39  ;;  %vm901_vm15 = vcmp.eq.f32.partialorder %v900_v41, 8.507059e+37  ;;  %v1317_v41 = vld [vmem:[%s1863_s10] ss:$0 sm:$0xff] }
 0x5c8   : > { %v1338_v33 = vpop.eup %1337 }
 0x5c9   : > { %v892_v34 = vmul.f32 %v1338_v33, %v890_v29  ;;  %vm897_vm10 = vweird.f32 %v1338_v33 }
 0x5ca   : > { %vm898_vm13 = vmor %vm896_vm12, %vm897_vm10 }
 0x5cb   : > { %v893_v38 = vsub.f32 1.0, %v892_v34 }
 0x5cd   : > { %v894_v40 = vmul.f32 %v1338_v33, %v893_v38 }
 0x5cf   : > { %v895_v43 = vadd.f32 %v1338_v33, %v894_v40 }
 0x5d1   : > { %v899_v47 = vsel %vm898_vm13, %v1338_v33, %v895_v43 }
 0x5d2   : > { %v904_v48 = vsel %vm901_vm15, %v903_v45, %v899_v47 }
 0x5d3   : > { %v905_v50 = vmul.f32 %v1332_v24, %v904_v48  ;;  %v997_v24 = vld [vmem:[%s1862_s9 + $0x8] sm:$0xff] }
 0x5d5   : > { %1232 = vmatmul.msk.f32.vlgmr.msrb.gmra.mxu0 %vm548_vm5, %v905_v50 }
 0x5d9   : > { %v677_v57 = vpop.permute.xlu1 %676 }
 0x5da   : > { %697 = vmatpush.msrb.mxu2 %v677_v57  ;;  %v1074_v57 = vld [vmem:[%s1864_s11 + $0x18] sm:$0xff] }
 0x5db   : > { %1221 = vmatmul.msk.f32.vlgmr.msrb.gmra.mxu2 %vm548_vm5, %v675_v58  ;;  %1099 = vmatpush.msra.mxu3 %v1074_v57 }
 0x5dc   : > { %823 = vmatpush.msra.mxu2 %v803_v59 }
 0x5dd   : > { %1100 = vmatpush.msra.mxu3 %v1073_v60 }
 0x5de   : > { %952 = vmatpush.msrb.mxu2 %v1233_v1  ;;  %v1071_v1 = vld [vmem:[%s1864_s11] sm:$0xff] }
 0x5df   : > { %1101 = vmatpush.msra.mxu3 %v1072_v62 }
 0x5e1   : > { %1102 = vmatpush.msra.mxu3 %v1071_v1 }
 0x5e3   : > { %1227 = vmatmul.msk.f32.vlgmr.msra.gmra.mxu2 %vm548_vm5, %v801_v63 }
 0x652   : > { %v929_v4 = vpop.f32.mrf.mxu0 }
 0x653   : > { %1234 = vmatmul.msk.f32.vlgmr.msrb.gmra.mxu2 %vm548_vm5, %v929_v4 }
 0x65e   : > { %v699_v5 = vpop.f32.mrf.mxu2 }
 0x65f   : > { %1223 = vmatmul.msk.f32.vlgmr.msrb.gmra.mxu1 %vm548_vm5, %v699_v5 }
 0x660   : > { %1019 = vmatpush.msrb.mxu1 %v999_v23 }
 0x666   : > { %v825_v6 = vpop.f32.mrf.mxu2 }
 0x667   : > { %1229 = vmatmul.msk.f32.vlgmr.msra.gmra.mxu1 %vm548_vm5, %v825_v6 }
 0x6d6   : > { %v954_v12 = vpop.f32.mrf.mxu2 }
 0x6dc   : > { %v724_v7 = vpop.f32.mrf.mxu1 }
 0x6dd   : > { %v748_v9 = vadd.f32 %v1727_v15, %v724_v7 }
 0x6e4   : > { %v850_v10 = vpop.f32.mrf.mxu1 }
 0x6e5   : > { %v853_v11 = vadd.f32 %v850_v10, %v748_v9 }
 0x6e7   : > { %v957_v13 = vadd.f32 %v954_v12, %v853_v11 }
 0x6e9   : > { %v958_v16 = vadd.f32 %v957_v13, %v1665_v0  ;;  %v998_v0 = vld [vmem:[%s1862_s9 + $0x10] sm:$0xff] }
 0x6ea   : > { %1020 = vmatpush.msrb.mxu1 %v998_v0 }
 0x6eb   : > { %v1759_v17 = vadd.f32 %v1314_v14, %v958_v16 }
 0x6ec   : > { %1021 = vmatpush.msrb.mxu1 %v997_v24 }
 0x6ed   : > { %v966_v18 = vsel %vm476_vm0, %v1759_v17, 0.0 }
 0x6ee   : > { %967 = vadd.xlane.f32.xlu1 %v966_v18  ;;  %1022 = vmatpush.msrb.mxu1 %v996_v25 }
 0x761   : > { %v968_v19 = vpop.xlane.xlu1 %967 }
 0x762   : > { %v969_v20 = vmul.f32 %v968_v19, %v1669_v8 }
 0x764   : > { %v970_v15 = vsub.f32 %v1759_v17, %v969_v20 }
 0x766   : > { %v971_v21 = vmul.f32 %v970_v15, %v970_v15 }
 0x768   : > { %v972_v22 = vsel %vm476_vm0, %v971_v21, 0.0 }
 0x769   : > { %973 = vadd.xlane.f32.xlu0 %v972_v22 }
 0x7dc   : > { %v974_v26 = vpop.xlane.xlu0 %973 }
 0x7dd   : > { %v975_v27 = vmul.f32 %v974_v26, %v1669_v8  ;;  %v1316_v8 = vld [vmem:[%s1861_s8] ss:$0 sm:$0xff] }
 0x7df   : > { %v976_v28 = vadd.f32 1e-05, %v975_v27 }
 0x7e1   : > { %1339 = vrsqrt.f32 %v976_v28  ;;  %vm983_vm8 = vweird.f32 %v976_v28 }
 0x7e7   : > { %v1340_v29 = vpop.eup %1339 }
 0x7e8   : > { %v978_v30 = vmul.f32 %v1340_v29, %v976_v28  ;;  %vm984_vm5 = vweird.f32 %v1340_v29  ;;  %v1318_v28 = vld [vmem:[%s1865_s12] ss:$0 sm:$0xff] }
 0x7e9   : > { %vm985_vm9 = vmor %vm983_vm8, %vm984_vm5 }
 0x7ea   : > { %v979_v31 = vmul.f32 %v1340_v29, %v978_v30 }
 0x7ec   : > { %v980_v32 = vmul.f32 0.5, %v979_v31 }
 0x7ee   : > { %v981_v33 = vsub.f32 1.5, %v980_v32 }
 0x7f0   : > { %v982_v34 = vmul.f32 %v1340_v29, %v981_v33 }
 0x7f2   : > { %v986_v37 = vsel %vm985_vm9, %v1340_v29, %v982_v34 }
 0x7f3   : > { %v987_v38 = vmul.f32 %v986_v37, %v970_v15 }
 0x7f5   : > { %v991_v39 = vmul.f32 %v1315_v36, %v987_v38 }
 0x7f7   : > { %v995_v40 = vadd.f32 %v1316_v8, %v991_v39 }
 0x7f9   : > { %1235 = vmatmul.msk.f32.vlgmr.msrb.gmra.mxu1 %vm476_vm0, %v995_v40 }
 0x876   : > { %v1024_v35 = vpop.f32.mrf.mxu1 }
 0x877   : > { %v1025_v42 = vadd.f32 %v1317_v41, %v1024_v35 }
 0x879   : > { %v1028_v43 = vmul.f32 0.70710677, %v1025_v42  ;;  %v1027_v25 = vmul.f32 0.5, %v1025_v42 }
 0x87b   : > { %v1029_v44 = vmul.f32 %v1028_v43, %v1028_v43 }
 0x87d   : > { %v1030_v45 = vmin.f32 %v1029_v44, 16.0 }
 0x87f   : > { %v1031_v47 = vmul.f32 2.1237322e-06, %v1030_v45  ;;  %v1042_v48 = vmul.f32 3.8918573e-05, %v1030_v45 }
 0x881   : > { %v1032_v50 = vadd.f32 0.00028619796, %v1031_v47  ;;  %v1043_v51 = vadd.f32 0.001143296, %v1042_v48 }
 0x883   : > { %v1033_v53 = vmul.f32 %v1032_v50, %v1030_v45  ;;  %v1044_v54 = vmul.f32 %v1043_v51, %v1030_v45 }
 0x885   : > { %v1045_v56 = vadd.f32 0.014752088, %v1044_v54  ;;  %v1034_v58 = vadd.f32 0.0036580483, %v1033_v53 }
 0x887   : > { %v1046_v59 = vmul.f32 %v1045_v56, %v1030_v45  ;;  %v1035_v63 = vmul.f32 %v1034_v58, %v1030_v45 }
 0x889   : > { %v1047_v61 = vadd.f32 0.112945676, %v1046_v59  ;;  %v1036_v4 = vadd.f32 0.05243302, %v1035_v63 }
 0x88b   : > { %v1048_v2 = vmul.f32 %v1047_v61, %v1030_v45  ;;  %v1037_v7 = vmul.f32 %v1036_v4, %v1030_v45 }
 0x88d   : > { %v1049_v3 = vadd.f32 0.4994258, %v1048_v2  ;;  %v1038_v9 = vadd.f32 0.18741608, %v1037_v7 }
 0x88f   : > { %v1050_v5 = vmul.f32 %v1049_v3, %v1030_v45  ;;  %v1039_v11 = vmul.f32 %v1038_v9, %v1030_v45 }
 0x891   : > { %v1051_v6 = vadd.f32 1.0, %v1050_v5  ;;  %v1040_v16 = vadd.f32 1.1283791, %v1039_v11 }
 0x893   : > { %1341 = vrcp.f32 %v1051_v6  ;;  %v1063_v14 = vand.u32 2147483648, %v1051_v6  ;;  %v1061_v19 = vand.u32 2147483647, %v1051_v6  ;;  %vm1057_vm11 = vweird.f32 %v1051_v6 }
 0x894   : > { %v1041_v21 = vmul.f32 %v1040_v16, %v1028_v43 }
 0x895   : > { %v1064_v15 = vor.u32 1.1754944e-38, %v1063_v14  ;;  %vm1062_vm13 = vcmp.eq.f32.partialorder %v1061_v19, 8.507059e+37 }
 0x899   : > { %v1342_v10 = vpop.eup %1341 }
 0x89a   : > { %v1053_v12 = vmul.f32 %v1342_v10, %v1051_v6  ;;  %vm1058_vm10 = vweird.f32 %v1342_v10 }
 0x89b   : > { %vm1059_vm12 = vmor %vm1057_vm11, %vm1058_vm10 }
 0x89c   : > { %v1054_v13 = vsub.f32 1.0, %v1053_v12 }
 0x89e   : > { %v1055_v18 = vmul.f32 %v1342_v10, %v1054_v13 }
 0x8a0   : > { %v1056_v20 = vadd.f32 %v1342_v10, %v1055_v18 }
 0x8a2   : > { %v1060_v22 = vsel %vm1059_vm12, %v1342_v10, %v1056_v20 }
 0x8a3   : > { %v1065_v23 = vsel %vm1062_vm13, %v1064_v15, %v1060_v22 }
 0x8a4   : > { %v1066_v0 = vmul.f32 %v1065_v23, %v1041_v21 }
 0x8a6   : > { %v1236_v24 = vclamps-f32 %v1066_v0, 1.0 }
 0x8a8   : > { %v1069_v26 = vadd.f32 1.0, %v1236_v24 }
 0x8aa   : > { %v1070_v27 = vmul.f32 %v1069_v26, %v1027_v25 }
 0x8ac   : > { %1237 = vmatmul.msk.f32.vlgmr.msra.gmra.mxu3 %vm1083_vm14, %v1070_v27 }
 0x92f   : > { %v1104_v29 = vpop.f32.mrf.mxu3 }
 0x930   : > { %v1105_v30 = vadd.f32 %v1318_v28, %v1104_v29 }
 0x932   : > { %v1107_v31 = vadd.f32 %v1105_v30, %v1759_v17 }
 0x934   : > { %1108 = vst.msk [vmem:[%s472_s24] sm:$0xff] %vm476_vm0, %v1107_v31 }
 0x935   : > { %1430 = shalt.err (!%p1427_p11)
}
 0x936   : > { %1248 = dma.vmem_to_hbm [thread:$0]  (%p1624_p3), %s1123_s23, 128, %s1125_s15, %s1110_s29  }
 0x937 PF: > { %s1888_s17 = sld [smem:[#allocation11_spill]]  ;;  %p1890_p12 = scmp.ge.s32.totalorder %s1473_s28, 2 }
 0x939   : > { %p1259_p13 = pnand %p1890_p12, %p1593_p6 }
 0x93b   : > { %p1260_p0 = pneg %p1259_p13 }
 0x93d   : > { %s1136_s30 = sand.u32 1, %s1888_s17  }
 0x93e   : > { %s1137_s18 = scalar_lea.sflag [#allocation4], %s1136_s30 }
 0x93f   : > { %1456 = dma.done.wait (%p1260_p0), %s1137_s18, 128  }
 0x940   : > { %1458 = vsyncadd (%p1260_p0), %s1137_s18, 4294967168  ;;  %s1891_s28 = sld [smem:[#allocation14_spill]]  ;;  %s1894_s25 = smov %s1465_s26 }
 0x941   : > { %s1892_s24 = sld [smem:[#allocation12_spill]] }
 0x942   : > { %s1893_s27 = sld [smem:[#allocation15_spill]] }
 0x946   : > { %p27_p5 = scmp.ge.s32.totalorder %s1891_s28, 4  }
 0x947   : > { %s1895_s26 = smov %s1892_s24 }
 0x948   :  { %29 = sbr.rel (!%p27_p5) target bundleno = 8 (0x8), region = 124 }
 0x94d   :  { %1143 = vsyncpa [#allocation3], 1 }
 0x94e   :  { %1145 = vsyncpa [#allocation3 + $0x1], 1 }
 0x94f   :  { %1146 = vsyncpa [#allocation6], 1 }
 0x950   :  { %1147 = vsyncpa [#allocation4], 1 }
 0x951   :  { %1149 = vsyncpa [#allocation4 + $0x1], 1 }

</bundles_post_ra>
